<compile_context>
chip_gen: v6e
topology: v6e:2x2x1
jax: 0.10.0
libtpu: 0.0.40
codegen_flags: <defaults>
</compile_context>

<pallas_src>
import jax
import jax.numpy as jnp
from jax.experimental import pallas as pl
from jax.experimental.pallas import tpu as pltpu

IN_FEATURES = 159              # MlpExtractor(159)
HIDDEN = 150                   # shared_net / action_net width
VALUE_OUT = 1                  # value_net output
HEAD_OUT = HIDDEN + VALUE_OUT  # 151 live columns in the fused head

H_PAD = 256                    # hidden / head width padded to lane-dense 2x128

SINGLE_STEP_MAX = 256          # <= this: one full-array block, no row padding
TM_CAP = 512                   # max rows per grid step


def _round_up(x, m):
    return (x + m - 1) // m * m


def _choose_tiles(B):
    """Pick (rows per grid step, padded batch)."""
    if B <= SINGLE_STEP_MAX:
        # Single grid step; block_shape == full array dims, so no row padding
        # (and no host-side pad kernel) is needed even for B = 2.
        return B, B
    # >= 2 grid steps so ("parallel",) can shard rows across both v7x
    # TensorCores; rows rounded to 16 (bf16 sublane packing), capped at 512
    # to keep per-step VMEM tiny while amortizing per-step overhead.
    tm = min(TM_CAP, _round_up(pl.cdiv(B, 2), 16))
    return tm, _round_up(B, tm)


def _actor_critic_kernel(x_ref,
                         w1_ref, b1_ref,
                         w2_ref, b2_ref,
                         w3_ref, b3_ref,
                         wh_ref, bh_ref,
                         out_ref):
    """3x (Linear + tanh) shared trunk, then one fused (action|value) head.

    Weights are bf16, biases f32; MXU accumulation is f32.  Activations are
    cast to bf16 only at the matmul inputs; tanh/bias-add run in f32.
    Output is a single lane-dense (tm, 256) f32 slab.
    """
    h = jnp.tanh(
        jnp.dot(x_ref[...], w1_ref[...], preferred_element_type=jnp.float32)
        + b1_ref[...])
    h = jnp.tanh(
        jnp.dot(h.astype(jnp.bfloat16), w2_ref[...],
                preferred_element_type=jnp.float32) + b2_ref[...])
    h = jnp.tanh(
        jnp.dot(h.astype(jnp.bfloat16), w3_ref[...],
                preferred_element_type=jnp.float32) + b3_ref[...])
    out_ref[...] = (
        jnp.dot(h.astype(jnp.bfloat16), wh_ref[...],
                preferred_element_type=jnp.float32) + bh_ref[...]
    ).astype(out_ref.dtype)


def prepare_params(params):
    """Pad weights, fuse the action/value heads, cast weights to bf16.

    Done once, outside the hot path.  w1 keeps its 159 contraction rows
    (only its output dim is padded); hidden dims are padded 150 -> 256."""
    (w1, b1), (w2, b2), (w3, b3), (wa, ba), (wv, bv) = params

    def pad_w(w, rows, cols):
        out = jnp.zeros((rows, cols), jnp.float32)
        out = out.at[: w.shape[0], : w.shape[1]].set(w)
        return out.astype(jnp.bfloat16)

    def pad_b(b, cols):
        out = jnp.zeros((1, cols), jnp.float32)
        return out.at[:, : b.shape[1]].set(b)

    # Fused head: columns [0:150] = action_net, column [150] = value_net,
    # columns [151:256] = zero padding (sliced off in the wrapper).
    wh = jnp.concatenate([wa, wv], axis=1)     # (150, 151)
    bh = jnp.concatenate([ba, bv], axis=1)     # (1, 151)

    return (pad_w(w1, IN_FEATURES, H_PAD), pad_b(b1, H_PAD),
            pad_w(w2, H_PAD, H_PAD), pad_b(b2, H_PAD),
            pad_w(w3, H_PAD, H_PAD), pad_b(b3, H_PAD),
            pad_w(wh, H_PAD, H_PAD), pad_b(bh, H_PAD))


@jax.jit
def actor_critic_forward(x, prepared):
    """x: (B, ...) with prod(...) == 159.  Returns (action (B,150), value (B,1))."""
    B = x.shape[0]
    # FlattenExtractor: nn.Flatten(start_dim=1)  (glue, not hot path)
    x_flat = x.reshape(B, -1)
    assert x_flat.shape[1] == IN_FEATURES
    x_bf16 = x_flat.astype(jnp.bfloat16)

    tm, b_pad = _choose_tiles(B)
    if b_pad > B:
        x_bf16 = jnp.pad(x_bf16, ((0, b_pad - B), (0, 0)))

    w1, b1, w2, b2, w3, b3, wh, bh = prepared

    def const_spec(shape):
        # Constant block index across the grid => Pallas keeps the block
        # resident and skips re-DMA between consecutive steps.
        return pl.BlockSpec(shape, lambda i: (0, 0))

    in_specs = [
        pl.BlockSpec((tm, IN_FEATURES), lambda i: (i, 0)),   # x rows over grid
        const_spec((IN_FEATURES, H_PAD)), const_spec((1, H_PAD)),
        const_spec((H_PAD, H_PAD)), const_spec((1, H_PAD)),
        const_spec((H_PAD, H_PAD)), const_spec((1, H_PAD)),
        const_spec((H_PAD, H_PAD)), const_spec((1, H_PAD)),
    ]

    out = pl.pallas_call(
        _actor_critic_kernel,
        grid=(b_pad // tm,),
        in_specs=in_specs,
        out_specs=pl.BlockSpec((tm, H_PAD), lambda i: (i, 0)),
        out_shape=jax.ShapeDtypeStruct((b_pad, H_PAD), jnp.float32),
        compiler_params=pltpu.CompilerParams(
            dimension_semantics=("parallel",)),
    )(x_bf16, w1, b1, w2, b2, w3, b3, wh, bh)

    action = out[:B, :HIDDEN]
    value = out[:B, HIDDEN:HEAD_OUT]
    return action, value


def init_params(key):
    """torch.nn.Linear-style init: U(-1/sqrt(fan_in), 1/sqrt(fan_in)).
    Weights stored as (in, out) so the kernel computes y = x @ W + b."""
    def linear(k, fan_in, fan_out):
        kw, kb = jax.random.split(k)
        bound = 1.0 / jnp.sqrt(jnp.float32(fan_in))
        w = jax.random.uniform(kw, (fan_in, fan_out), jnp.float32,
                               minval=-bound, maxval=bound)
        b = jax.random.uniform(kb, (1, fan_out), jnp.float32,
                               minval=-bound, maxval=bound)
        return w, b

    k1, k2, k3, k4, k5 = jax.random.split(key, 5)
    return (
        linear(k1, IN_FEATURES, HIDDEN),   # shared_net.0
        linear(k2, HIDDEN, HIDDEN),        # shared_net.2
        linear(k3, HIDDEN, HIDDEN),        # shared_net.4
        linear(k4, HIDDEN, HIDDEN),        # action_net
        linear(k5, HIDDEN, VALUE_OUT),     # value_net
    )


def reference_forward_f32(x, params):
    """Pure-JAX f32 reference (original module semantics)."""
    B = x.shape[0]
    h = x.reshape(B, -1).astype(jnp.float32)
    (w1, b1), (w2, b2), (w3, b3), (wa, ba), (wv, bv) = params
    h = jnp.tanh(h @ w1 + b1)
    h = jnp.tanh(h @ w2 + b2)
    h = jnp.tanh(h @ w3 + b3)
    return h @ wa + ba, h @ wv + bv


def reference_forward_bf16(x, params):
    """Mirrors kernel numerics: bf16 matmul operands, f32 accumulation."""
    B = x.shape[0]
    h = x.reshape(B, -1).astype(jnp.float32)

    def mm(a, w):
        return jax.lax.dot(a.astype(jnp.bfloat16), w.astype(jnp.bfloat16),
                           preferred_element_type=jnp.float32)

    (w1, b1), (w2, b2), (w3, b3), (wa, ba), (wv, bv) = params
    h = jnp.tanh(mm(h, w1) + b1)
    h = jnp.tanh(mm(h, w2) + b2)
    h = jnp.tanh(mm(h, w3) + b3)
    return mm(h, wa) + ba, mm(h, wv) + bv


if __name__ == "__main__":
    key = jax.random.PRNGKey(0)
    k_params, k_x = jax.random.split(key)

    params = init_params(k_params)
    prepared = prepare_params(params)

    # Input: batch=2, shape (2, 3, 53) -> flattens to (2, 159), matching
    # MlpExtractor(159).
    x = jax.random.normal(k_x, (2, 3, 53), dtype=jnp.float32)

    action, value = actor_critic_forward(x, prepared)
    jax.block_until_ready((action, value))

    assert action.shape == (2, HIDDEN) and value.shape == (2, VALUE_OUT)

    # Tight check against a reference that mirrors the kernel's bf16/f32 math.
    ref_a16, ref_v16 = reference_forward_bf16(x, params)
    assert jnp.allclose(action, ref_a16, atol=5e-3, rtol=0)
    assert jnp.allclose(value, ref_v16, atol=5e-3, rtol=0)

    # Loose check against the full-f32 original-module semantics.
    ref_a32, ref_v32 = reference_forward_f32(x, params)
    assert jnp.allclose(action, ref_a32, atol=5e-2, rtol=0)
    assert jnp.allclose(value, ref_v32, atol=5e-2, rtol=0)

    # Exercise the multi-step tiling path once (B=272 -> tm=144, 2 grid steps,
    # row padding 272->288), and check it too.
    x_big = jax.random.normal(jax.random.PRNGKey(1), (272, 3, 53),
                              dtype=jnp.float32)
    a_big, v_big = actor_critic_forward(x_big, prepared)
    jax.block_until_ready((a_big, v_big))
    assert a_big.shape == (272, HIDDEN) and v_big.shape == (272, VALUE_OUT)
    ra_big, rv_big = reference_forward_bf16(x_big, params)
    assert jnp.allclose(a_big, ra_big, atol=5e-3, rtol=0)
    assert jnp.allclose(v_big, rv_big, atol=5e-3, rtol=0)

    print("KERNEL_OK")
</pallas_src>

<mosaic_0001>
module attributes {stable_mosaic.version = 11 : i64} {
  func.func @_actor_critic_kernel(%arg0: i32, %arg1: memref<2x159xbf16, #tpu.memory_space<vmem>>, %arg2: memref<159x256xbf16, #tpu.memory_space<vmem>>, %arg3: memref<1x256xf32, #tpu.memory_space<vmem>>, %arg4: memref<256x256xbf16, #tpu.memory_space<vmem>>, %arg5: memref<1x256xf32, #tpu.memory_space<vmem>>, %arg6: memref<256x256xbf16, #tpu.memory_space<vmem>>, %arg7: memref<1x256xf32, #tpu.memory_space<vmem>>, %arg8: memref<256x256xbf16, #tpu.memory_space<vmem>>, %arg9: memref<1x256xf32, #tpu.memory_space<vmem>>, %arg10: memref<2x256xf32, #tpu.memory_space<vmem>>) attributes {dimension_semantics = [#tpu.dimension_semantics<parallel>], iteration_bounds = array<i64: 1>, scalar_prefetch = 0 : i64, scratch_operands = 0 : i64, tpu.core_type = #tpu.core_type<tc>, window_params = [{transform_indices = @transform_0, window_bounds = array<i64: 2, 159>}, {pipeline_mode = #tpu.pipeline_mode<synchronous>, transform_indices = @transform_1, window_bounds = array<i64: 159, 256>}, {pipeline_mode = #tpu.pipeline_mode<synchronous>, transform_indices = @transform_2, window_bounds = array<i64: 1, 256>}, {pipeline_mode = #tpu.pipeline_mode<synchronous>, transform_indices = @transform_3, window_bounds = array<i64: 256, 256>}, {pipeline_mode = #tpu.pipeline_mode<synchronous>, transform_indices = @transform_4, window_bounds = array<i64: 1, 256>}, {pipeline_mode = #tpu.pipeline_mode<synchronous>, transform_indices = @transform_5, window_bounds = array<i64: 256, 256>}, {pipeline_mode = #tpu.pipeline_mode<synchronous>, transform_indices = @transform_6, window_bounds = array<i64: 1, 256>}, {pipeline_mode = #tpu.pipeline_mode<synchronous>, transform_indices = @transform_7, window_bounds = array<i64: 256, 256>}, {pipeline_mode = #tpu.pipeline_mode<synchronous>, transform_indices = @transform_8, window_bounds = array<i64: 1, 256>}, {transform_indices = @transform_9, window_bounds = array<i64: 2, 256>}]} {
    %c0 = arith.constant 0 : index
    %c0_0 = arith.constant 0 : index
    %0 = vector.load %arg1[%c0, %c0_0] : memref<2x159xbf16, #tpu.memory_space<vmem>>, vector<2x159xbf16>
    %c0_1 = arith.constant 0 : index
    %c0_2 = arith.constant 0 : index
    %1 = vector.load %arg2[%c0_1, %c0_2] : memref<159x256xbf16, #tpu.memory_space<vmem>>, vector<159x256xbf16>
    %cst = arith.constant dense<0.000000e+00> : vector<2x256xf32>
    %2 = tpu.matmul %0, %1, %cst {dimension_numbers = #tpu.dot_dimension_numbers<[1], [0], [0], [1], [0, 0, 1, 1], [], []>} : vector<2x159xbf16>, vector<159x256xbf16>, vector<2x256xf32> -> vector<2x256xf32>
    %c0_3 = arith.constant 0 : index
    %c0_4 = arith.constant 0 : index
    %3 = vector.load %arg3[%c0_3, %c0_4] : memref<1x256xf32, #tpu.memory_space<vmem>>, vector<1x256xf32>
    %4 = vector.broadcast %3 : vector<1x256xf32> to vector<2x256xf32>
    %5 = arith.addf %2, %4 : vector<2x256xf32>
    %6 = math.tanh %5 : vector<2x256xf32>
    %7 = arith.truncf %6 : vector<2x256xf32> to vector<2x256xbf16>
    %c0_5 = arith.constant 0 : index
    %c0_6 = arith.constant 0 : index
    %8 = vector.load %arg4[%c0_5, %c0_6] : memref<256x256xbf16, #tpu.memory_space<vmem>>, vector<256x256xbf16>
    %cst_7 = arith.constant dense<0.000000e+00> : vector<2x256xf32>
    %9 = tpu.matmul %7, %8, %cst_7 {dimension_numbers = #tpu.dot_dimension_numbers<[1], [0], [0], [1], [0, 0, 1, 1], [], []>} : vector<2x256xbf16>, vector<256x256xbf16>, vector<2x256xf32> -> vector<2x256xf32>
    %c0_8 = arith.constant 0 : index
    %c0_9 = arith.constant 0 : index
    %10 = vector.load %arg5[%c0_8, %c0_9] : memref<1x256xf32, #tpu.memory_space<vmem>>, vector<1x256xf32>
    %11 = vector.broadcast %10 : vector<1x256xf32> to vector<2x256xf32>
    %12 = arith.addf %9, %11 : vector<2x256xf32>
    %13 = math.tanh %12 : vector<2x256xf32>
    %14 = arith.truncf %13 : vector<2x256xf32> to vector<2x256xbf16>
    %c0_10 = arith.constant 0 : index
    %c0_11 = arith.constant 0 : index
    %15 = vector.load %arg6[%c0_10, %c0_11] : memref<256x256xbf16, #tpu.memory_space<vmem>>, vector<256x256xbf16>
    %cst_12 = arith.constant dense<0.000000e+00> : vector<2x256xf32>
    %16 = tpu.matmul %14, %15, %cst_12 {dimension_numbers = #tpu.dot_dimension_numbers<[1], [0], [0], [1], [0, 0, 1, 1], [], []>} : vector<2x256xbf16>, vector<256x256xbf16>, vector<2x256xf32> -> vector<2x256xf32>
    %c0_13 = arith.constant 0 : index
    %c0_14 = arith.constant 0 : index
    %17 = vector.load %arg7[%c0_13, %c0_14] : memref<1x256xf32, #tpu.memory_space<vmem>>, vector<1x256xf32>
    %18 = vector.broadcast %17 : vector<1x256xf32> to vector<2x256xf32>
    %19 = arith.addf %16, %18 : vector<2x256xf32>
    %20 = math.tanh %19 : vector<2x256xf32>
    %21 = arith.truncf %20 : vector<2x256xf32> to vector<2x256xbf16>
    %c0_15 = arith.constant 0 : index
    %c0_16 = arith.constant 0 : index
    %22 = vector.load %arg8[%c0_15, %c0_16] : memref<256x256xbf16, #tpu.memory_space<vmem>>, vector<256x256xbf16>
    %cst_17 = arith.constant dense<0.000000e+00> : vector<2x256xf32>
    %23 = tpu.matmul %21, %22, %cst_17 {dimension_numbers = #tpu.dot_dimension_numbers<[1], [0], [0], [1], [0, 0, 1, 1], [], []>} : vector<2x256xbf16>, vector<256x256xbf16>, vector<2x256xf32> -> vector<2x256xf32>
    %c0_18 = arith.constant 0 : index
    %c0_19 = arith.constant 0 : index
    %24 = vector.load %arg9[%c0_18, %c0_19] : memref<1x256xf32, #tpu.memory_space<vmem>>, vector<1x256xf32>
    %25 = vector.broadcast %24 : vector<1x256xf32> to vector<2x256xf32>
    %26 = arith.addf %23, %25 : vector<2x256xf32>
    %c0_20 = arith.constant 0 : index
    %c0_21 = arith.constant 0 : index
    %27 = vector.load %arg10[%c0_20, %c0_21] : memref<2x256xf32, #tpu.memory_space<vmem>>, vector<2x256xf32>
    tpu.vector_store %arg10[%c0_20, %c0_21], %26 {strides = array<i32>} : memref<2x256xf32, #tpu.memory_space<vmem>>, vector<2x256xf32>,
    return
  }
  func.func @transform_0(%arg0: i32) -> (i32, i32) {
    %c0_i32 = arith.constant 0 : i32
    %c0_i32_0 = arith.constant 0 : i32
    return %arg0, %c0_i32 : i32, i32
  }
  func.func @transform_1(%arg0: i32) -> (i32, i32) {
    %c0_i32 = arith.constant 0 : i32
    %c0_i32_0 = arith.constant 0 : i32
    %c0_i32_1 = arith.constant 0 : i32
    return %c0_i32, %c0_i32_0 : i32, i32
  }
  func.func @transform_2(%arg0: i32) -> (i32, i32) {
    %c0_i32 = arith.constant 0 : i32
    %c0_i32_0 = arith.constant 0 : i32
    %c0_i32_1 = arith.constant 0 : i32
    return %c0_i32, %c0_i32_0 : i32, i32
  }
  func.func @transform_3(%arg0: i32) -> (i32, i32) {
    %c0_i32 = arith.constant 0 : i32
    %c0_i32_0 = arith.constant 0 : i32
    %c0_i32_1 = arith.constant 0 : i32
    return %c0_i32, %c0_i32_0 : i32, i32
  }
  func.func @transform_4(%arg0: i32) -> (i32, i32) {
    %c0_i32 = arith.constant 0 : i32
    %c0_i32_0 = arith.constant 0 : i32
    %c0_i32_1 = arith.constant 0 : i32
    return %c0_i32, %c0_i32_0 : i32, i32
  }
  func.func @transform_5(%arg0: i32) -> (i32, i32) {
    %c0_i32 = arith.constant 0 : i32
    %c0_i32_0 = arith.constant 0 : i32
    %c0_i32_1 = arith.constant 0 : i32
    return %c0_i32, %c0_i32_0 : i32, i32
  }
  func.func @transform_6(%arg0: i32) -> (i32, i32) {
    %c0_i32 = arith.constant 0 : i32
    %c0_i32_0 = arith.constant 0 : i32
    %c0_i32_1 = arith.constant 0 : i32
    return %c0_i32, %c0_i32_0 : i32, i32
  }
  func.func @transform_7(%arg0: i32) -> (i32, i32) {
    %c0_i32 = arith.constant 0 : i32
    %c0_i32_0 = arith.constant 0 : i32
    %c0_i32_1 = arith.constant 0 : i32
    return %c0_i32, %c0_i32_0 : i32, i32
  }
  func.func @transform_8(%arg0: i32) -> (i32, i32) {
    %c0_i32 = arith.constant 0 : i32
    %c0_i32_0 = arith.constant 0 : i32
    %c0_i32_1 = arith.constant 0 : i32
    return %c0_i32, %c0_i32_0 : i32, i32
  }
  func.func @transform_9(%arg0: i32) -> (i32, i32) {
    %c0_i32 = arith.constant 0 : i32
    %c0_i32_0 = arith.constant 0 : i32
    return %arg0, %c0_i32 : i32, i32
  }
}

</mosaic_0001>

<bundles_post_ra>
// kernel: actor_critic_forward.1
= control target key start
LH: loop header
LB: loop body
LE: loop exit
PB: predicated region body
PF: predicated region fallthrough
CT: control target
= control target key end

     0   :  { %14 = vsyncpa [#allocation3], 0  ;;  %s1589_s0 = inlined_call_operand.vmem [shape: bf16[2,159], index: 0, kind: input, shape index: {}]   ;;  %s1590_s1 = inlined_call_operand.hbm [shape: bf16[159,256], index: 1, kind: input, shape index: {}]   ;;  %s1591_s2 = inlined_call_operand.vmem [shape: f32[1,256], index: 2, kind: input, shape index: {}]   ;;  %s1592_s3 = inlined_call_operand.hbm [shape: bf16[256,256], index: 3, kind: input, shape index: {}]   ;;  %s1593_s4 = inlined_call_operand.vmem [shape: f32[1,256], index: 4, kind: input, shape index: {}]   ;;  %s1594_s5 = inlined_call_operand.hbm [shape: bf16[256,256], index: 5, kind: input, shape index: {}]   ;;  %s1595_s6 = inlined_call_operand.vmem [shape: f32[1,256], index: 6, kind: input, shape index: {}]   ;;  %s1596_s7 = inlined_call_operand.hbm [shape: bf16[256,256], index: 7, kind: input, shape index: {}]   ;;  %s1597_s8 = inlined_call_operand.vmem [shape: f32[1,256], index: 8, kind: input, shape index: {}]   ;;  %s1598_s9 = inlined_call_operand.vmem [shape: f32[2,256], index: 9, kind: output, shape index: {}]  }
   0x1   :  { %15 = vsyncpa [#allocation5], 0 }
   0x2   :  { %16 = vsyncpa [#allocation8], 0  ;;  %s1463_s30 = smov [#allocation4]   ;;  %s1464_s11 = smov [#allocation2]  }
   0x3   :  { %s38_s10 = sshll.u32 %s1463_s30, 4  ;;  %s24_s12 = sshll.u32 %s1464_s11, 4  ;;  %s39_s10 = int_to_ptr.vmem [resolvable:$true] %s38_s10  ;;  %s25_s12 = int_to_ptr.vmem [resolvable:$true] %s24_s12 }
   0x4   :  { %s1385_s13 = scalar_lea.vmem %s39_s10, 4096  ;;  %p1390_p1 = scmp.lt.s32.totalorder %s39_s10, %s39_s10 }
   0x5   :  { %p1386_p0 = scmp.ne.s32.totalorder %s39_s10, %s1385_s13  ;;  %p1391_p2 = scmp.lt.s32.totalorder %s1385_s13, %s1385_s13 }
   0x7   :  { %p1392_p3 = por %p1391_p2, %p1390_p1 }
   0x9   :  { %p1393_p4 = pnand %p1392_p3, %p1386_p0 }
   0xb   :  { %1396 = shalt.err (!%p1393_p4)
}
   0xc   :  { %s1465_s14 = smov 128   ;;  %s1466_s15 = smov 8  }
   0xd   :  { %44 = dma.hbm_to_vmem [thread:$0]  %s1592_s3, 4096, %s39_s10, [#allocation5], %s1465_s14, %s1465_s14, %s1466_s15  }
   0xe   :  { %s1405_s18 = scalar_lea.vmem %s25_s12, 2560  ;;  %p1410_p6 = scmp.lt.s32.totalorder %s25_s12, %s25_s12 }
   0xf   :  { %p1406_p5 = scmp.ne.s32.totalorder %s25_s12, %s1405_s18  ;;  %p1411_p7 = scmp.lt.s32.totalorder %s1405_s18, %s1405_s18 }
  0x11   :  { %p1412_p8 = por %p1411_p7, %p1410_p6 }
  0x13   :  { %p1413_p9 = pnand %p1412_p8, %p1406_p5 }
  0x15   :  { %1416 = shalt.err (!%p1413_p9)
}
  0x16   :  { %30 = dma.hbm_to_vmem [thread:$0]  %s1590_s1, 2560, %s25_s12, [#allocation3], %s1465_s14, %s1465_s14, %s1466_s15  }
  0x17   :  { %s1467_s21 = smov [#allocation6]   ;;  %s1468_s23 = smov [#allocation7]  }
  0x18   :  { %s52_s22 = sshll.u32 %s1467_s21, 4  ;;  %s66_s24 = sshll.u32 %s1468_s23, 4  ;;  %s53_s22 = int_to_ptr.vmem [resolvable:$true] %s52_s22  ;;  %s67_s24 = int_to_ptr.vmem [resolvable:$true] %s66_s24 }
  0x19   :  { %s1425_s3 = scalar_lea.vmem %s53_s22, 4096  ;;  %p1430_p11 = scmp.lt.s32.totalorder %s53_s22, %s53_s22 }
  0x1a   :  { %p1426_p10 = scmp.ne.s32.totalorder %s53_s22, %s1425_s3  ;;  %p1431_p12 = scmp.lt.s32.totalorder %s1425_s3, %s1425_s3 }
  0x1c   :  { %p1432_p13 = por %p1431_p12, %p1430_p11 }
  0x1e   :  { %p1433_p0 = pnand %p1432_p13, %p1426_p10 }
  0x20   :  { %1436 = shalt.err (!%p1433_p0)
}
  0x21   :  { %58 = dma.hbm_to_vmem [thread:$0]  %s1594_s5, 4096, %s53_s22, [#allocation5], %s1465_s14, %s1465_s14, %s1466_s15  }
  0x22   :  { %s1445_s1 = scalar_lea.vmem %s67_s24, 4096  ;;  %p1450_p2 = scmp.lt.s32.totalorder %s67_s24, %s67_s24 }
  0x23   :  { %p1446_p1 = scmp.ne.s32.totalorder %s67_s24, %s1445_s1  ;;  %p1451_p3 = scmp.lt.s32.totalorder %s1445_s1, %s1445_s1 }
  0x25   :  { %p1452_p4 = por %p1451_p3, %p1450_p2 }
  0x27   :  { %p1453_p5 = pnand %p1452_p4, %p1446_p1 }
  0x29   :  { %1456 = shalt.err (!%p1453_p5)
}
  0x2a   :  { %72 = dma.hbm_to_vmem [thread:$0]  %s1596_s7, 4096, %s67_s24, [#allocation8], %s1465_s14, %s1465_s14, %s1466_s15  }
  0x2b   :  { %1457 = dma.done.wait [#allocation3], 2560  }
  0x2c   :  { %1458 = vsyncadd [#allocation3], 4294964736 }
  0x2d   :  { %1459 = dma.done.wait [#allocation5], 8192  }
  0x2e   :  { %1460 = vsyncadd [#allocation5], 4294959104 }
  0x2f   :  { %1461 = dma.done.wait [#allocation8], 4096  }
  0x30   :  { %1462 = vsyncadd [#allocation8], 4294963200  ;;  %v1191_v0 = vld [vmem:[#allocation2 + $0x74] ss:$8 sps:$4 sm:$0xff]   ;;  %v1193_v1 = vld [vmem:[#allocation2 + $0x70] ss:$8 sps:$4 sm:$0xff]   ;;  %v111_v5 = vlaneseq }
  0x31   :  { %257 = vmatprep.subr.bf16.mxu0 %v1191_v0  ;;  %v1194_v2 = vld [vmem:[#allocation2 + $0x64] ss:$8 sps:$4 sm:$0xff]   ;;  %v1196_v3 = vld [vmem:[#allocation2 + $0x60] ss:$8 sps:$4 sm:$0xff]   ;;  %v1197_v4 = vld [vmem:[#allocation2 + $0x54] ss:$8 sps:$4 sm:$0xff]  }
  0x32   :  { %258 = vmatpush1.bf16.msra.mxu0 %v1193_v1  ;;  %v1469_v6 = vmov 1966171168   ;;  %v1199_v8 = vld [vmem:[#allocation2 + $0x50] ss:$8 sps:$4 sm:$0xff]   ;;  %v1200_v9 = vld [vmem:[#allocation2 + $0x44] ss:$8 sps:$4 sm:$0xff]  }
  0x33   :  { %259 = vmatprep.subr.bf16.mxu0 %v1194_v2  ;;  %v131_v7 = vunpack.c.l.s4 %v1469_v6  ;;  %v1545_v10 = vshrl.u32 %v111_v5, 7  ;;  %v1202_v12 = vld [vmem:[#allocation2 + $0x40] ss:$8 sps:$4 sm:$0xff]   ;;  %v1203_v13 = vld [vmem:[#allocation2 + $0x34] ss:$8 sps:$4 sm:$0xff]   ;;  %vm243_vm0 = vcmask 252928  }
  0x34   :  { %v1205_v15 = vld [vmem:[#allocation2 + $0x30] ss:$8 sps:$4 sm:$0xff]   ;;  %v1553_v16 = vld.sshfl [vmem:[%s1589_s0] sm:$0x11 pattern:$0x75316420] }
  0x35   :  { %v132_v11 = vunpack.c.0.s8 %v131_v7  ;;  %v129_v17 = vcombine.high %v1553_v16, %v1553_v16  ;;  %v1221_v18 = vld [vmem:[#allocation4 + $0x74] ss:$8 sps:$4 sm:$0xff]   ;;  %v1223_v19 = vld [vmem:[#allocation4 + $0x70] ss:$8 sps:$4 sm:$0xff]   ;;  %v1206_v20 = vld [vmem:[#allocation2 + $0x24] ss:$8 sps:$4 sm:$0xff]  }
  0x36   :  { %260 = vmatpush1.bf16.msra.mxu0 %v1196_v3  ;;  %506 = vmatprep.subr.bf16.mxu1 %v1221_v18  ;;  %v1224_v22 = vld [vmem:[#allocation4 + $0x64] ss:$8 sps:$4 sm:$0xff]   ;;  %v1226_v23 = vld [vmem:[#allocation4 + $0x60] ss:$8 sps:$4 sm:$0xff]   ;;  %v1227_v24 = vld [vmem:[#allocation4 + $0x54] ss:$8 sps:$4 sm:$0xff]  }
  0x37   :  { %261 = vmatprep.subr.bf16.mxu0 %v1197_v4  ;;  %v1548_v14 = vsub.s32 %v132_v11, %v1545_v10  ;;  %507 = vmatpush1.bf16.msra.mxu1 %v1223_v19  ;;  %v1208_v25 = vld [vmem:[#allocation2 + $0x20] ss:$8 sps:$4 sm:$0xff]   ;;  %vm247_vm1 = vcmask 1046528   ;;  %v1209_v26 = vld [vmem:[#allocation2 + $0x14] ss:$8 sps:$4 sm:$0xff]   ;;  %vm248_vm2 = vcmask 1047552  }
  0x38   :  { %508 = vmatprep.subr.bf16.mxu1 %v1224_v22  ;;  %v1229_v27 = vld [vmem:[#allocation4 + $0x50] ss:$8 sps:$4 sm:$0xff]   ;;  %v1470_v28 = vmov 65535   ;;  %v1230_v30 = vld [vmem:[#allocation4 + $0x44] ss:$8 sps:$4 sm:$0xff]  }
  0x39   :  { %v143_v21 = vrot.slane %v129_v17, %v1548_v14  ;;  %v249_v29 = vsel %vm247_vm1, 4294967295, %v1470_v28  ;;  %v1211_v31 = vld [vmem:[#allocation2 + $0x10] ss:$8 sps:$4 sm:$0xff]   ;;  %v1212_v32 = vld [vmem:[#allocation2 + $0x4] ss:$8 sps:$4 sm:$0xff]   ;;  %v136_v49 = vrot.slane %v1553_v16, %v1548_v14  ;;  %v1567_v28 = vsub.s32 1, %v1545_v10 }
  0x3a   :  { %262 = vmatpush1.bf16.msra.mxu0 %v1199_v8  ;;  %v1215_v33 = vld [vmem:[#allocation2 + $0x94] ss:$8 sps:$4 sm:$0xff]   ;;  %v1214_v34 = vld [vmem:[#allocation2] ss:$8 sps:$4 sm:$0xff]   ;;  %v250_v35 = vsel %vm248_vm2, %v249_v29, 0 }
  0x3b   :  { %263 = vmatprep.subr.bf16.mxu0 %v1200_v9  ;;  %1085 = vmatprep.mubr.msk.bf16.mxu0 %vm243_vm0, %v143_v21  ;;  %v1232_v36 = vld [vmem:[#allocation4 + $0x40] ss:$8 sps:$4 sm:$0xff]   ;;  %v1233_v37 = vld [vmem:[#allocation4 + $0x34] ss:$8 sps:$4 sm:$0xff]   ;;  %v1217_v38 = vld [vmem:[#allocation2 + $0x90] ss:$8 sps:$4 sm:$0xff]   ;;  %v255_v39 = vand.u32 %v1215_v33, %v250_v35 }
  0x3c   :  { %509 = vmatpush1.bf16.msra.mxu1 %v1226_v23  ;;  %v1235_v40 = vld [vmem:[#allocation4 + $0x30] ss:$8 sps:$4 sm:$0xff]   ;;  %v1236_v41 = vld [vmem:[#allocation4 + $0x24] ss:$8 sps:$4 sm:$0xff]   ;;  %v252_v43 = vand.u32 %v1217_v38, %v250_v35  ;;  %v1238_v44 = vld [vmem:[#allocation4 + $0x20] ss:$8 sps:$4 sm:$0xff]  }
  0x3d   :  { %510 = vmatprep.subr.bf16.mxu1 %v1227_v24  ;;  %v1218_v42 = vld [vmem:[#allocation2 + $0x84] ss:$8 sps:$4 sm:$0xff]   ;;  %v1239_v45 = vld [vmem:[#allocation4 + $0x14] ss:$8 sps:$4 sm:$0xff]   ;;  %v1220_v46 = vld [vmem:[#allocation2 + $0x80] ss:$8 sps:$4 sm:$0xff]  }
  0x3e   :  { %264 = vmatpush1.bf16.msra.mxu0 %v1202_v12  ;;  %v1241_v47 = vld [vmem:[#allocation4 + $0x10] ss:$8 sps:$4 sm:$0xff]   ;;  %v1242_v48 = vld [vmem:[#allocation4 + $0x4] ss:$8 sps:$4 sm:$0xff]   ;;  %v1244_v50 = vld [vmem:[#allocation4] ss:$8 sps:$4 sm:$0xff]  }
  0x3f   :  { %265 = vmatprep.subr.bf16.mxu0 %v1203_v13  ;;  %v1245_v51 = vld [vmem:[#allocation4 + $0xf4] ss:$8 sps:$4 sm:$0xff]   ;;  %v1247_v52 = vld [vmem:[#allocation4 + $0xf0] ss:$8 sps:$4 sm:$0xff]   ;;  %v1248_v53 = vld [vmem:[#allocation4 + $0xe4] ss:$8 sps:$4 sm:$0xff]  }
  0x40   :  { %511 = vmatpush1.bf16.msra.mxu1 %v1229_v27  ;;  %v1250_v54 = vld [vmem:[#allocation4 + $0xe0] ss:$8 sps:$4 sm:$0xff]   ;;  %v1251_v55 = vld [vmem:[#allocation4 + $0xd4] ss:$8 sps:$4 sm:$0xff]   ;;  %v1253_v56 = vld [vmem:[#allocation4 + $0xd0] ss:$8 sps:$4 sm:$0xff]  }
  0x41   :  { %512 = vmatprep.subr.bf16.mxu1 %v1230_v30  ;;  %v1254_v57 = vld [vmem:[#allocation4 + $0xc4] ss:$8 sps:$4 sm:$0xff]   ;;  %v1256_v58 = vld [vmem:[#allocation4 + $0xc0] ss:$8 sps:$4 sm:$0xff]   ;;  %v1257_v59 = vld [vmem:[#allocation4 + $0xb4] ss:$8 sps:$4 sm:$0xff]  }
  0x42   :  { %266 = vmatpush1.bf16.msra.mxu0 %v1205_v15  ;;  %v1259_v60 = vld [vmem:[#allocation4 + $0xb0] ss:$8 sps:$4 sm:$0xff]   ;;  %v1260_v61 = vld [vmem:[#allocation4 + $0xa4] ss:$8 sps:$4 sm:$0xff]   ;;  %v1262_v62 = vld [vmem:[#allocation4 + $0xa0] ss:$8 sps:$4 sm:$0xff]  }
  0x43   :  { %267 = vmatprep.subr.bf16.mxu0 %v1206_v20  ;;  %v1263_v63 = vld [vmem:[#allocation4 + $0x94] ss:$8 sps:$4 sm:$0xff]   ;;  %v1265_v0 = vld [vmem:[#allocation4 + $0x90] ss:$8 sps:$4 sm:$0xff]   ;;  %v1266_v1 = vld [vmem:[#allocation4 + $0x84] ss:$8 sps:$4 sm:$0xff]  }
  0x44   :  { %513 = vmatpush1.bf16.msra.mxu1 %v1232_v36  ;;  %v1268_v2 = vld [vmem:[#allocation4 + $0x80] ss:$8 sps:$4 sm:$0xff]   ;;  %v1269_v3 = vld [vmem:[#allocation6 + $0x70] ss:$8 sps:$4 sm:$0xff]   ;;  %v1271_v4 = vld [vmem:[#allocation6 + $0x74] ss:$8 sps:$4 sm:$0xff]  }
  0x45   :  { %514 = vmatprep.subr.bf16.mxu1 %v1233_v37  ;;  %v1274_v5 = vld [vmem:[#allocation6 + $0x64] ss:$8 sps:$4 sm:$0xff]   ;;  %v1272_v6 = vld [vmem:[#allocation6 + $0x60] ss:$8 sps:$4 sm:$0xff]   ;;  %v1277_v7 = vld [vmem:[#allocation6 + $0x54] ss:$8 sps:$4 sm:$0xff]  }
  0x46   :  { %268 = vmatpush1.bf16.msra.mxu0 %v1208_v25  ;;  %v1275_v8 = vld [vmem:[#allocation6 + $0x50] ss:$8 sps:$4 sm:$0xff]   ;;  %v1280_v9 = vld [vmem:[#allocation6 + $0x44] ss:$8 sps:$4 sm:$0xff]   ;;  %v1278_v11 = vld [vmem:[#allocation6 + $0x40] ss:$8 sps:$4 sm:$0xff]  }
  0x47   :  { %269 = vmatprep.subr.bf16.mxu0 %v1209_v26  ;;  %v1283_v12 = vld [vmem:[#allocation6 + $0x34] ss:$8 sps:$4 sm:$0xff]   ;;  %v1281_v13 = vld [vmem:[#allocation6 + $0x30] ss:$8 sps:$4 sm:$0xff]   ;;  %v1286_v14 = vld [vmem:[#allocation6 + $0x24] ss:$8 sps:$4 sm:$0xff]  }
  0x48   :  { %515 = vmatpush1.bf16.msra.mxu1 %v1235_v40  ;;  %v1284_v15 = vld [vmem:[#allocation6 + $0x20] ss:$8 sps:$4 sm:$0xff]   ;;  %v1289_v16 = vld [vmem:[#allocation6 + $0x14] ss:$8 sps:$4 sm:$0xff]   ;;  %v1287_v17 = vld [vmem:[#allocation6 + $0x10] ss:$8 sps:$4 sm:$0xff]  }
  0x49   :  { %516 = vmatprep.subr.bf16.mxu1 %v1236_v41  ;;  %v1292_v18 = vld [vmem:[#allocation6 + $0x4] ss:$8 sps:$4 sm:$0xff]   ;;  %v1290_v19 = vld [vmem:[#allocation6] ss:$8 sps:$4 sm:$0xff]   ;;  %v1295_v20 = vld [vmem:[#allocation6 + $0xf4] ss:$8 sps:$4 sm:$0xff]  }
  0x4a   :  { %270 = vmatpush1.bf16.msra.mxu0 %v1211_v31  ;;  %v1293_v21 = vld [vmem:[#allocation6 + $0xf0] ss:$8 sps:$4 sm:$0xff]   ;;  %v1298_v22 = vld [vmem:[#allocation6 + $0xe4] ss:$8 sps:$4 sm:$0xff]   ;;  %v1296_v23 = vld [vmem:[#allocation6 + $0xe0] ss:$8 sps:$4 sm:$0xff]  }
  0x4b   :  { %271 = vmatprep.subr.bf16.mxu0 %v1212_v32  ;;  %v1301_v24 = vld [vmem:[#allocation6 + $0xd4] ss:$8 sps:$4 sm:$0xff]   ;;  %v1299_v25 = vld [vmem:[#allocation6 + $0xd0] ss:$8 sps:$4 sm:$0xff]   ;;  %v1561_v26 = vsub.s32 0, %v1545_v10 }
  0x4c   :  { %517 = vmatpush1.bf16.msra.mxu1 %v1238_v44  ;;  %v109_v27 = vld [vmem:[%s1591_s2] sm:$0x3]  ;;  %v1304_v10 = vld [vmem:[#allocation6 + $0xc4] ss:$8 sps:$4 sm:$0xff]  }
  0x4d   :  { %518 = vmatprep.subr.bf16.mxu1 %v1239_v45  ;;  %v114_v29 = vrot.slane %v109_v27, %v1561_v26  ;;  %v118_v30 = vrot.slane %v109_v27, %v1567_v28  ;;  %v1302_v41 = vld [vmem:[#allocation6 + $0xc0] ss:$8 sps:$4 sm:$0xff]   ;;  %v1310_v44 = vld [vmem:[#allocation6 + $0xa4] ss:$8 sps:$4 sm:$0xff]  }
  0x4e   :  { %272 = vmatpush1.bf16.msra.mxu0 %v1214_v34  ;;  %v1308_v45 = vld [vmem:[#allocation6 + $0xa0] ss:$8 sps:$4 sm:$0xff]   ;;  %v1358_v27 = vld [vmem:[#allocation7 + $0xa4] ss:$8 sps:$4 sm:$0xff]  }
  0x4f   :  { %285 = vmatprep.subr.bf16.mxu0 %v255_v39 }
  0x50   :  { %519 = vmatpush1.bf16.msra.mxu1 %v1241_v47  ;;  %v1311_v47 = vld [vmem:[#allocation6 + $0x90] ss:$8 sps:$4 sm:$0xff]  }
  0x51   :  { %520 = vmatprep.subr.bf16.mxu1 %v1242_v48  ;;  %v1316_v48 = vld [vmem:[#allocation6 + $0x84] ss:$8 sps:$4 sm:$0xff]  }
  0x52   :  { %286 = vmatpush2.bf16.msra.mxu0 %v252_v43  ;;  %v1305_v43 = vld [vmem:[#allocation6 + $0xb0] ss:$8 sps:$4 sm:$0xff]  }
  0x53   :  { %287 = vmatprep.subr.bf16.mxu0 %v1218_v42  ;;  %v1307_v42 = vld [vmem:[#allocation6 + $0xb4] ss:$8 sps:$4 sm:$0xff]  }
  0x54   :  { %521 = vmatpush1.bf16.msra.mxu1 %v1244_v50  ;;  %v1317_v50 = vld [vmem:[#allocation7 + $0x70] ss:$8 sps:$4 sm:$0xff]  }
  0x55   :  { %522 = vmatprep.subr.bf16.mxu1 %v1245_v51  ;;  %v1319_v51 = vld [vmem:[#allocation7 + $0x74] ss:$8 sps:$4 sm:$0xff]  }
  0x56   :  { %288 = vmatpush2.bf16.msra.mxu0 %v1220_v46  ;;  %v1313_v46 = vld [vmem:[#allocation6 + $0x94] ss:$8 sps:$4 sm:$0xff]  }
  0x57   :  { %755 = vmatprep.subr.bf16.mxu0 %v1271_v4  ;;  %v1346_v4 = vld [vmem:[#allocation7 + $0xe4] ss:$8 sps:$4 sm:$0xff]  }
  0x58   :  { %523 = vmatpush2.bf16.msra.mxu1 %v1247_v52  ;;  %v1322_v52 = vld [vmem:[#allocation7 + $0x64] ss:$8 sps:$4 sm:$0xff]  }
  0x59   :  { %290 = vmatmul.mubr.bf16.vlgmr.msra.gmra.mxu0 %v136_v49  ;;  %524 = vmatprep.subr.bf16.mxu1 %v1248_v53  ;;  %v1314_v49 = vld [vmem:[#allocation6 + $0x80] ss:$8 sps:$4 sm:$0xff]  }
  0x5a   :  { %756 = vmatpush1.bf16.msra.mxu0 %v1269_v3  ;;  %v1320_v53 = vld [vmem:[#allocation7 + $0x60] ss:$8 sps:$4 sm:$0xff]   ;;  %v1341_v3 = vld [vmem:[#allocation7 + $0xf0] ss:$8 sps:$4 sm:$0xff]  }
  0x5b   :  { %757 = vmatprep.subr.bf16.mxu0 %v1274_v5  ;;  %v1344_v5 = vld [vmem:[#allocation7 + $0xe0] ss:$8 sps:$4 sm:$0xff]  }
  0x5c   :  { %525 = vmatpush2.bf16.msra.mxu1 %v1250_v54  ;;  %v1325_v54 = vld [vmem:[#allocation7 + $0x54] ss:$8 sps:$4 sm:$0xff]  }
  0x5d   :  { %526 = vmatprep.subr.bf16.mxu1 %v1251_v55  ;;  %v1323_v55 = vld [vmem:[#allocation7 + $0x50] ss:$8 sps:$4 sm:$0xff]  }
  0x5e   :  { %758 = vmatpush1.bf16.msra.mxu0 %v1272_v6  ;;  %v1349_v6 = vld [vmem:[#allocation7 + $0xd4] ss:$8 sps:$4 sm:$0xff]  }
  0x5f   :  { %759 = vmatprep.subr.bf16.mxu0 %v1277_v7  ;;  %v1347_v7 = vld [vmem:[#allocation7 + $0xd0] ss:$8 sps:$4 sm:$0xff]  }
  0x60   :  { %527 = vmatpush2.bf16.msra.mxu1 %v1253_v56  ;;  %v1328_v56 = vld [vmem:[#allocation7 + $0x44] ss:$8 sps:$4 sm:$0xff]  }
  0x61   :  { %528 = vmatprep.subr.bf16.mxu1 %v1254_v57  ;;  %v1326_v57 = vld [vmem:[#allocation7 + $0x40] ss:$8 sps:$4 sm:$0xff]  }
  0x62   :  { %760 = vmatpush1.bf16.msra.mxu0 %v1275_v8  ;;  %v334_v8 = vld [vmem:[%s1593_s4] sm:$0x3] }
  0x63   :  { %761 = vmatprep.subr.bf16.mxu0 %v1280_v9  ;;  %v339_v9 = vrot.slane %v334_v8, %v1561_v26 }
  0x64   :  { %529 = vmatpush2.bf16.msra.mxu1 %v1256_v58  ;;  %v1331_v58 = vld [vmem:[#allocation7 + $0x34] ss:$8 sps:$4 sm:$0xff]  }
  0x65   :  { %530 = vmatprep.subr.bf16.mxu1 %v1257_v59  ;;  %v1329_v59 = vld [vmem:[#allocation7 + $0x30] ss:$8 sps:$4 sm:$0xff]  }
  0x66   :  { %762 = vmatpush1.bf16.msra.mxu0 %v1278_v11  ;;  %v343_v11 = vrot.slane %v334_v8, %v1567_v28 }
  0x67   :  { %763 = vmatprep.subr.bf16.mxu0 %v1283_v12 }
  0x68   :  { %531 = vmatpush2.bf16.msra.mxu1 %v1259_v60  ;;  %v1334_v60 = vld [vmem:[#allocation7 + $0x24] ss:$8 sps:$4 sm:$0xff]  }
  0x69   :  { %532 = vmatprep.subr.bf16.mxu1 %v1260_v61  ;;  %v1332_v61 = vld [vmem:[#allocation7 + $0x20] ss:$8 sps:$4 sm:$0xff]  }
  0x6a   :  { %764 = vmatpush1.bf16.msra.mxu0 %v1281_v13 }
  0x6b   :  { %765 = vmatprep.subr.bf16.mxu0 %v1286_v14 }
  0x6c   :  { %533 = vmatpush2.bf16.msra.mxu1 %v1262_v62  ;;  %v1337_v62 = vld [vmem:[#allocation7 + $0x14] ss:$8 sps:$4 sm:$0xff]  }
  0x6d   :  { %534 = vmatprep.subr.bf16.mxu1 %v1263_v63  ;;  %v1335_v63 = vld [vmem:[#allocation7 + $0x10] ss:$8 sps:$4 sm:$0xff]  }
  0x6e   :  { %766 = vmatpush1.bf16.msra.mxu0 %v1284_v15 }
  0x6f   :  { %767 = vmatprep.subr.bf16.mxu0 %v1289_v16 }
  0x70   :  { %535 = vmatpush2.bf16.msra.mxu1 %v1265_v0  ;;  %v1340_v0 = vld [vmem:[#allocation7 + $0x4] ss:$8 sps:$4 sm:$0xff]  }
  0x71   :  { %536 = vmatprep.subr.bf16.mxu1 %v1266_v1  ;;  %v1338_v1 = vld [vmem:[#allocation7] ss:$8 sps:$4 sm:$0xff]  }
  0x72   :  { %768 = vmatpush1.bf16.msra.mxu0 %v1287_v17 }
  0x73   :  { %769 = vmatprep.subr.bf16.mxu0 %v1292_v18 }
  0x74   :  { %537 = vmatpush2.bf16.msra.mxu1 %v1268_v2  ;;  %v1343_v2 = vld [vmem:[#allocation7 + $0xf4] ss:$8 sps:$4 sm:$0xff]  }
  0x75   :  { %1004 = vmatprep.subr.bf16.mxu1 %v1319_v51 }
  0x76   :  { %770 = vmatpush1.bf16.msra.mxu0 %v1290_v19 }
  0x77   :  { %771 = vmatprep.subr.bf16.mxu0 %v1295_v20 }
  0x7a   :  { %772 = vmatpush2.bf16.msra.mxu0 %v1293_v21 }
  0x7b   :  { %773 = vmatprep.subr.bf16.mxu0 %v1298_v22  ;;  %v1352_v22 = vld [vmem:[#allocation7 + $0xc4] ss:$8 sps:$4 sm:$0xff]  }
  0x7e   :  { %774 = vmatpush2.bf16.msra.mxu0 %v1296_v23  ;;  %v1350_v23 = vld [vmem:[#allocation7 + $0xc0] ss:$8 sps:$4 sm:$0xff]  }
  0x7f   :  { %775 = vmatprep.subr.bf16.mxu0 %v1301_v24  ;;  %v1355_v24 = vld [vmem:[#allocation7 + $0xb4] ss:$8 sps:$4 sm:$0xff]  }
  0x82   :  { %776 = vmatpush2.bf16.msra.mxu0 %v1299_v25  ;;  %v1353_v25 = vld [vmem:[#allocation7 + $0xb0] ss:$8 sps:$4 sm:$0xff]  }
  0x83   :  { %777 = vmatprep.subr.bf16.mxu0 %v1304_v10 }
  0x86   :  { %778 = vmatpush2.bf16.msra.mxu0 %v1302_v41 }
  0x87   :  { %779 = vmatprep.subr.bf16.mxu0 %v1307_v42 }
  0x8a   :  { %780 = vmatpush2.bf16.msra.mxu0 %v1305_v43 }
  0x8b   :  { %781 = vmatprep.subr.bf16.mxu0 %v1310_v44 }
  0x8e   :  { %782 = vmatpush2.bf16.msra.mxu0 %v1308_v45 }
  0x8f   :  { %783 = vmatprep.subr.bf16.mxu0 %v1313_v46  ;;  %v832_v46 = vld [vmem:[%s1597_s8] sm:$0x3] }
  0x92   :  { %784 = vmatpush2.bf16.msra.mxu0 %v1311_v47  ;;  %v837_v47 = vrot.slane %v832_v46, %v1561_v26 }
  0x93   :  { %785 = vmatprep.subr.bf16.mxu0 %v1316_v48  ;;  %v841_v48 = vrot.slane %v832_v46, %v1567_v28 }
  0x96   :  { %786 = vmatpush2.bf16.msra.mxu0 %v1314_v49 }
 0x119   :  { %v291_v31 = vpop.f32.mrf.mxu0 }
 0x11a   :  { %v292_v32 = vadd.f32 %v291_v31, %v114_v29  ;;  %v1356_v29 = vld [vmem:[#allocation7 + $0xa0] ss:$8 sps:$4 sm:$0xff]   ;;  %v1359_v31 = vld [vmem:[#allocation7 + $0x90] ss:$8 sps:$4 sm:$0xff]  }
 0x11b   :  { %v293_v33 = vpop.f32.mrf.mxu0 }
 0x11c   :  { %v294_v34 = vadd.f32 %v293_v33, %v118_v30  ;;  %1365 = vtanh.f32 %v292_v32  ;;  %v1361_v30 = vld [vmem:[#allocation7 + $0x94] ss:$8 sps:$4 sm:$0xff]   ;;  %v1364_v32 = vld [vmem:[#allocation7 + $0x84] ss:$8 sps:$4 sm:$0xff]   ;;  %v1362_v33 = vld [vmem:[#allocation7 + $0x80] ss:$8 sps:$4 sm:$0xff]  }
 0x11d   :  { %v295_v35 = vpop.f32.mrf.mxu0 }
 0x11e   :  { %1367 = vtanh.f32 %v294_v34  ;;  %v583_v34 = vld [vmem:[%s1595_s6] sm:$0x3] }
 0x11f   :  { %v296_v36 = vpop.f32.mrf.mxu0  ;;  %v588_v35 = vrot.slane %v583_v34, %v1561_v26 }
 0x120   :  { %v592_v36 = vrot.slane %v583_v34, %v1567_v28 }
 0x129   :  { %v1366_v37 = vpop.eup %1365 }
 0x12a   :  { %v300_v40 = vpack.c.bf16 %v1366_v37, %v1366_v37 }
 0x12b   :  { %v1368_v38 = vpop.eup %1367 }
 0x12c   :  { %v301_v39 = vpack.c.bf16 %v1368_v38, %v1368_v38 }
 0x12e   :  { %538 = vmatprep.mubr.bf16.mxu1 %v301_v39 }
 0x12f   :  { %539 = vmatmul.mubr.bf16.vlgmr.msra.gmra.mxu1 %v300_v40 }
 0x130   :  { %1005 = vmatpush1.bf16.msra.mxu1 %v1317_v50 }
 0x131   :  { %1006 = vmatprep.subr.bf16.mxu1 %v1322_v52 }
 0x134   :  { %1007 = vmatpush1.bf16.msra.mxu1 %v1320_v53 }
 0x135   :  { %1008 = vmatprep.subr.bf16.mxu1 %v1325_v54 }
 0x138   :  { %1009 = vmatpush1.bf16.msra.mxu1 %v1323_v55 }
 0x139   :  { %1010 = vmatprep.subr.bf16.mxu1 %v1328_v56 }
 0x13c   :  { %1011 = vmatpush1.bf16.msra.mxu1 %v1326_v57 }
 0x13d   :  { %1012 = vmatprep.subr.bf16.mxu1 %v1331_v58 }
 0x140   :  { %1013 = vmatpush1.bf16.msra.mxu1 %v1329_v59 }
 0x141   :  { %1014 = vmatprep.subr.bf16.mxu1 %v1334_v60 }
 0x144   :  { %1015 = vmatpush1.bf16.msra.mxu1 %v1332_v61 }
 0x145   :  { %1016 = vmatprep.subr.bf16.mxu1 %v1337_v62 }
 0x148   :  { %1017 = vmatpush1.bf16.msra.mxu1 %v1335_v63 }
 0x149   :  { %1018 = vmatprep.subr.bf16.mxu1 %v1340_v0 }
 0x14c   :  { %1019 = vmatpush1.bf16.msra.mxu1 %v1338_v1 }
 0x14d   :  { %1020 = vmatprep.subr.bf16.mxu1 %v1343_v2 }
 0x150   :  { %1021 = vmatpush2.bf16.msra.mxu1 %v1341_v3 }
 0x151   :  { %1022 = vmatprep.subr.bf16.mxu1 %v1346_v4 }
 0x154   :  { %1023 = vmatpush2.bf16.msra.mxu1 %v1344_v5 }
 0x155   :  { %1024 = vmatprep.subr.bf16.mxu1 %v1349_v6 }
 0x158   :  { %1025 = vmatpush2.bf16.msra.mxu1 %v1347_v7 }
 0x159   :  { %1026 = vmatprep.subr.bf16.mxu1 %v1352_v22 }
 0x15c   :  { %1027 = vmatpush2.bf16.msra.mxu1 %v1350_v23 }
 0x15d   :  { %1028 = vmatprep.subr.bf16.mxu1 %v1355_v24 }
 0x160   :  { %1029 = vmatpush2.bf16.msra.mxu1 %v1353_v25 }
 0x161   :  { %1030 = vmatprep.subr.bf16.mxu1 %v1358_v27 }
 0x164   :  { %1031 = vmatpush2.bf16.msra.mxu1 %v1356_v29 }
 0x165   :  { %1032 = vmatprep.subr.bf16.mxu1 %v1361_v30 }
 0x168   :  { %1033 = vmatpush2.bf16.msra.mxu1 %v1359_v31 }
 0x169   :  { %1034 = vmatprep.subr.bf16.mxu1 %v1364_v32 }
 0x16c   :  { %1035 = vmatpush2.bf16.msra.mxu1 %v1362_v33 }
 0x1ef   :  { %v540_v12 = vpop.f32.mrf.mxu1 }
 0x1f0   :  { %v541_v13 = vadd.f32 %v540_v12, %v339_v9 }
 0x1f1   :  { %v542_v14 = vpop.f32.mrf.mxu1 }
 0x1f2   :  { %v543_v15 = vadd.f32 %v542_v14, %v343_v11  ;;  %1369 = vtanh.f32 %v541_v13 }
 0x1f3   :  { %v544_v16 = vpop.f32.mrf.mxu1 }
 0x1f4   :  { %1371 = vtanh.f32 %v543_v15 }
 0x1f5   :  { %v545_v17 = vpop.f32.mrf.mxu1 }
 0x1ff   :  { %v1370_v18 = vpop.eup %1369 }
 0x200   :  { %v549_v21 = vpack.c.bf16 %v1370_v18, %v1370_v18 }
 0x201   :  { %v1372_v19 = vpop.eup %1371 }
 0x202   :  { %v550_v20 = vpack.c.bf16 %v1372_v19, %v1372_v19 }
 0x204   :  { %787 = vmatprep.mubr.bf16.mxu0 %v550_v20 }
 0x205   :  { %788 = vmatmul.mubr.bf16.vlgmr.msra.gmra.mxu0 %v549_v21 }
 0x2c5   :  { %v789_v37 = vpop.f32.mrf.mxu0 }
 0x2c6   :  { %v790_v38 = vadd.f32 %v789_v37, %v588_v35 }
 0x2c7   :  { %v791_v39 = vpop.f32.mrf.mxu0 }
 0x2c8   :  { %v792_v40 = vadd.f32 %v791_v39, %v592_v36  ;;  %1373 = vtanh.f32 %v790_v38 }
 0x2c9   :  { %v793_v10 = vpop.f32.mrf.mxu0 }
 0x2ca   :  { %1375 = vtanh.f32 %v792_v40 }
 0x2cb   :  { %v794_v41 = vpop.f32.mrf.mxu0 }
 0x2d5   :  { %v1374_v42 = vpop.eup %1373 }
 0x2d6   :  { %v798_v45 = vpack.c.bf16 %v1374_v42, %v1374_v42 }
 0x2d7   :  { %v1376_v43 = vpop.eup %1375 }
 0x2d8   :  { %v799_v44 = vpack.c.bf16 %v1376_v43, %v1376_v43 }
 0x2da   :  { %1036 = vmatprep.mubr.bf16.mxu1 %v799_v44 }
 0x2db   :  { %1037 = vmatmul.mubr.bf16.vlgmr.msra.gmra.mxu1 %v798_v45 }
 0x39b   :  { %v1038_v49 = vpop.f32.mrf.mxu1 }
 0x39c   :  { %v1039_v51 = vadd.f32 %v1038_v49, %v837_v47 }
 0x39d   :  { %v1040_v50 = vpop.f32.mrf.mxu1 }
 0x39e   :  { %v1041_v52 = vadd.f32 %v1040_v50, %v841_v48 }
 0x39f   :  { %v1042_v53 = vpop.f32.mrf.mxu1 }
 0x3a0   :  { %v1047_v54 = vcombine.low %v1039_v51, %v1041_v52 }
 0x3a1   :  { %v1043_v55 = vpop.f32.mrf.mxu1 }
 0x3a2   :  { %1182 = vst.sshfl [vmem:[%s1598_s9] sm:$0x33 pattern:$0x76325410] %v1047_v54 }
 0x3a3   :  { %1061 = vsyncpa [#allocation3], 1 }
 0x3a4   :  { %1062 = vsyncpa [#allocation5], 1 }
 0x3a5   :  { %1063 = vsyncpa [#allocation8], 1 }

</bundles_post_ra>
